<compile_context>
chip_gen: v6e
topology: v6e:2x2x1
jax: 0.10.0
libtpu: 0.0.40
codegen_flags: <defaults>
</compile_context>

<pallas_src>
import jax
import jax.numpy as jnp
from jax.experimental import pallas as pl
from jax.experimental.pallas import tpu as pltpu


def _scale3d_kernel(x_ref, g_ref, b_ref, o_ref):
    # x_ref: (tn, tm); g_ref / b_ref: (tn, 1) f32 -> lane-broadcast on the VPU.
    x = x_ref[...].astype(jnp.float32)
    o_ref[...] = (x * g_ref[...] + b_ref[...]).astype(o_ref.dtype)


def _round_down(v, m):
    return max((v // m) * m, m)


def _round_up(v, m):
    return ((v + m - 1) // m) * m


def _choose_tile(extent, unit, max_tile):
    """Tile size for one axis.

    Returns the full extent if it fits within `max_tile` (full-dim blocks are
    always layout-legal).  Otherwise returns the largest multiple of `unit`
    <= max_tile that divides `extent` exactly (no ragged tail -> unmasked
    lane-dense stores); falls back to the multiple leaving the smallest tail
    (ties -> larger tile).
    """
    if extent <= max_tile:
        return extent
    hi = _round_down(min(max_tile, extent), unit)
    best_t, best_rem = hi, extent % hi
    t = hi
    while t >= unit:
        rem = extent % t
        if rem == 0:
            return t
        if rem < best_rem:
            best_t, best_rem = t, rem
        t -= unit
    return best_t


def _vmem_capacity_bytes():
    """Physical per-core VMEM, with a safe 128 MiB fallback."""
    try:
        return int(pltpu.get_tpu_info().vmem_capacity_bytes)
    except Exception:
        return 128 * 1024 * 1024


def scale3d_forward(x, gamma, beta, *, donate_x=False):
    """Per-channel scale + shift on a (B, C, D, H, W) tensor.

    x     : (B, C, D, H, W)
    gamma : (C,)  learnable scale (kept in f32 for the math)
    beta  : (C,)  learnable shift (kept in f32 for the math)
    returns y with y[:, c] = x[:, c] * gamma[c] + beta[c], dtype = x.dtype
    """
    B, C, D, H, W = x.shape
    N = B * C
    M = D * H * W

    # Zero-cost contiguous view: one streaming pass, no transposes.
    x2d = x.reshape(N, M)

    # Per-row scale/shift (row r -> channel r % C), f32 compute precision.
    g2d = jnp.tile(gamma.astype(jnp.float32), (B,)).reshape(N, 1)
    b2d = jnp.tile(beta.astype(jnp.float32), (B,)).reshape(N, 1)

    itemsize = jnp.dtype(x.dtype).itemsize
    # Sublane multiple depends on packing: 8 (f32), 16 (bf16), 32 (int8/fp8).
    sub = max(8, 32 // itemsize)

    # Generation-specific byte budget per block.  v7x signature: 64 MiB VMEM
    # per TensorCore (and 2 TCs/chip); v5e/v6e have 128 MiB.
    vmem_cap = _vmem_capacity_bytes()
    two_core = vmem_cap <= 64 * 1024 * 1024
    target_bytes = (4 if two_core else 8) * 1024 * 1024

    # Columns (lane axis): full M if it fits the budget at the minimum row
    # count, else the largest divisor-friendly multiple of 128.
    max_cols = min(_round_down(target_bytes // (sub * itemsize), 128), 32768)
    tm = _choose_tile(M, 128, max_cols)

    # Rows (sublane axis): fill the remaining byte budget, divisor-friendly,
    # rounded to the dtype sublane multiple.
    max_rows = max(_round_down(target_bytes // (tm * itemsize), sub), sub)
    tn = _choose_tile(N, sub, max_rows)

    # v7x has 2 TensorCores: guarantee >= 2 blocks on a "parallel" axis so
    # both cores stream data (no-op / negligible on single-TC v5e/v6e).
    if two_core and pl.cdiv(N, tn) * pl.cdiv(M, tm) < 2:
        tn_half = _round_up(pl.cdiv(N, 2), sub)
        tm_half = _round_up(pl.cdiv(M, 2), 128)
        if tn_half < N:
            tn = tn_half
        elif tm_half < M:
            tm = tm_half
        # else: tensor too small to split; a single block is fine.

    grid = (pl.cdiv(N, tn), pl.cdiv(M, tm))

    # Computed VMEM limit: double-buffered in + out blocks, tiny gamma/beta
    # slivers, plus slack.  Never request the whole physical VMEM (headroom
    # for compiler-internal scratch, esp. on v7x's 64 MiB).
    block_bytes = tn * tm * itemsize
    vmem_limit = 4 * block_bytes + 8 * tn * 4 + (2 << 20)
    vmem_limit = int(min(max(vmem_limit, 16 << 20), vmem_cap - (16 << 20)))

    cost = pl.CostEstimate(
        flops=2 * N * M,
        bytes_accessed=2 * N * M * itemsize + 2 * N * 4,
        transcendentals=0,
    )

    y2d = pl.pallas_call(
        _scale3d_kernel,
        out_shape=jax.ShapeDtypeStruct((N, M), x.dtype),
        grid_spec=pltpu.PrefetchScalarGridSpec(
            num_scalar_prefetch=0,
            grid=grid,
            in_specs=[
                pl.BlockSpec((tn, tm), lambda i, j: (i, j)),
                pl.BlockSpec((tn, 1), lambda i, j: (i, 0)),
                pl.BlockSpec((tn, 1), lambda i, j: (i, 0)),
            ],
            out_specs=pl.BlockSpec((tn, tm), lambda i, j: (i, j)),
        ),
        compiler_params=pltpu.CompilerParams(
            dimension_semantics=("parallel", "parallel"),
            vmem_limit_bytes=vmem_limit,
        ),
        cost_estimate=cost,
        # Only alias when the caller actually donates x (avoids a second
        # N*M HBM buffer; no bandwidth change).
        input_output_aliases=({0: 0} if donate_x else {}),
    )(x2d, g2d, b2d)

    # Zero-cost reshape back to NCDHW.
    return y2d.reshape(B, C, D, H, W)


def _reference(x, gamma, beta):
    """Pure-JAX reference of Scale3d.forward (f32 math, cast at store)."""
    y = (x.astype(jnp.float32) * gamma[None, :, None, None, None].astype(jnp.float32)
         + beta[None, :, None, None, None].astype(jnp.float32))
    return y.astype(x.dtype)


if __name__ == "__main__":
    key = jax.random.PRNGKey(0)
    k_x, k_g, k_b = jax.random.split(key, 3)

    # Small shapes consistent with the module's 5-D (B, C, D, H, W) input.
    B, C, D, H, W = 2, 4, 8, 16, 16
    x = jax.random.normal(k_x, (B, C, D, H, W), dtype=jnp.float32)
    # The module initializes gamma=1, beta=0; random values exercise the math.
    gamma = 1.0 + 0.1 * jax.random.normal(k_g, (C,), dtype=jnp.float32)
    beta = 0.1 * jax.random.normal(k_b, (C,), dtype=jnp.float32)

    out = scale3d_forward(x, gamma, beta)
    out = jax.block_until_ready(out)

    ref = _reference(x, gamma, beta)
    assert out.shape == (B, C, D, H, W)
    assert jnp.allclose(out, ref, atol=1e-6, rtol=1e-6)

    print("KERNEL_OK")
</pallas_src>

<mosaic_0001>
module attributes {stable_mosaic.version = 11 : i64} {
  func.func @_scale3d_kernel(%arg0: i32, %arg1: i32, %arg2: memref<8x2048xf32, #tpu.memory_space<vmem>>, %arg3: memref<8x1xf32, #tpu.memory_space<vmem>>, %arg4: memref<8x1xf32, #tpu.memory_space<vmem>>, %arg5: memref<8x2048xf32, #tpu.memory_space<vmem>>) attributes {dimension_semantics = [#tpu.dimension_semantics<parallel>, #tpu.dimension_semantics<parallel>], iteration_bounds = array<i64: 1, 1>, scalar_prefetch = 0 : i64, scratch_operands = 0 : i64, tpu.core_type = #tpu.core_type<tc>, window_params = [{transform_indices = @transform_0, window_bounds = array<i64: 8, 2048>}, {transform_indices = @transform_1, window_bounds = array<i64: 8, 1>}, {transform_indices = @transform_2, window_bounds = array<i64: 8, 1>}, {transform_indices = @transform_3, window_bounds = array<i64: 8, 2048>}]} {
    %c0 = arith.constant 0 : index
    %c0_0 = arith.constant 0 : index
    %0 = vector.load %arg2[%c0, %c0_0] : memref<8x2048xf32, #tpu.memory_space<vmem>>, vector<8x2048xf32>
    %c0_1 = arith.constant 0 : index
    %c0_2 = arith.constant 0 : index
    %1 = vector.load %arg3[%c0_1, %c0_2] : memref<8x1xf32, #tpu.memory_space<vmem>>, vector<8x1xf32>
    %2 = vector.broadcast %1 : vector<8x1xf32> to vector<8x2048xf32>
    %3 = arith.mulf %0, %2 : vector<8x2048xf32>
    %c0_3 = arith.constant 0 : index
    %c0_4 = arith.constant 0 : index
    %4 = vector.load %arg4[%c0_3, %c0_4] : memref<8x1xf32, #tpu.memory_space<vmem>>, vector<8x1xf32>
    %5 = vector.broadcast %4 : vector<8x1xf32> to vector<8x2048xf32>
    %6 = arith.addf %3, %5 : vector<8x2048xf32>
    %c0_5 = arith.constant 0 : index
    %c0_6 = arith.constant 0 : index
    %7 = vector.load %arg5[%c0_5, %c0_6] : memref<8x2048xf32, #tpu.memory_space<vmem>>, vector<8x2048xf32>
    tpu.vector_store %arg5[%c0_5, %c0_6], %6 {strides = array<i32>} : memref<8x2048xf32, #tpu.memory_space<vmem>>, vector<8x2048xf32>,
    return
  }
  func.func @transform_0(%arg0: i32, %arg1: i32) -> (i32, i32) {
    %c0_i32 = arith.constant 0 : i32
    return %arg0, %arg1 : i32, i32
  }
  func.func @transform_1(%arg0: i32, %arg1: i32) -> (i32, i32) {
    %c0_i32 = arith.constant 0 : i32
    %c0_i32_0 = arith.constant 0 : i32
    return %arg0, %c0_i32 : i32, i32
  }
  func.func @transform_2(%arg0: i32, %arg1: i32) -> (i32, i32) {
    %c0_i32 = arith.constant 0 : i32
    %c0_i32_0 = arith.constant 0 : i32
    return %arg0, %c0_i32 : i32, i32
  }
  func.func @transform_3(%arg0: i32, %arg1: i32) -> (i32, i32) {
    %c0_i32 = arith.constant 0 : i32
    return %arg0, %arg1 : i32, i32
  }
}

</mosaic_0001>

<bundles_post_ra>
// kernel: tpu_custom_call.1
= control target key start
LH: loop header
LB: loop body
LE: loop exit
PB: predicated region body
PF: predicated region fallthrough
CT: control target
= control target key end

     0   :  { %8 = vsyncpa [#allocation3], 0  ;;  %s201_s0 = inlined_call_operand.hbm [shape: f32[8,2048], index: 0, kind: input, shape index: {}]   ;;  %s202_s1 = inlined_call_operand.vmem [shape: f32[8,1], index: 1, kind: input, shape index: {}]   ;;  %s203_s2 = inlined_call_operand.vmem [shape: f32[8,1], index: 2, kind: input, shape index: {}]   ;;  %s204_s3 = inlined_call_operand.hbm [shape: f32[8,2048], index: 3, kind: output, shape index: {}]  }
   0x1   :  { %9 = vsyncpa [#allocation4], 0  ;;  %s166_s12 = smov [#allocation2]  }
   0x2   :  { %s16_s13 = sshll.u32 %s166_s12, 4  ;;  %s17_s13 = int_to_ptr.vmem [resolvable:$true] %s16_s13 }
   0x3   :  { %s130_s14 = scalar_lea.vmem %s17_s13, 2048  ;;  %p135_p1 = scmp.lt.s32.totalorder %s17_s13, %s17_s13 }
   0x4   :  { %p131_p0 = scmp.ne.s32.totalorder %s17_s13, %s130_s14  ;;  %p136_p2 = scmp.lt.s32.totalorder %s130_s14, %s130_s14 }
   0x6   :  { %p137_p3 = por %p136_p2, %p135_p1 }
   0x8   :  { %p138_p4 = pnand %p137_p3, %p131_p0 }
   0xa   :  { %141 = shalt.err (!%p138_p4)
}
   0xb   :  { %19 = dma.hbm_to_vmem [thread:$0]  %s201_s0, 2048, %s17_s13, [#allocation3]  }
   0xc   :  { %162 = dma.done.wait [#allocation3], 2048  }
   0xd   :  { %163 = vsyncadd [#allocation3], 4294965248  ;;  %v167_v0 = vmov 0   ;;  %v43_v1 = vld [vmem:[%s202_s1] sm:$0xff]  ;;  %v28_v4 = vld [vmem:[#allocation2 + $0x8] sm:$0xff]  ;;  %s168_s0 = smov [#allocation5]  }
   0xe   :  { %121 = vset.pattern.permute.xlu0 %v167_v0  ;;  %v65_v2 = vld [vmem:[%s203_s2] sm:$0xff]  ;;  %v29_v5 = vld [vmem:[#allocation2 + $0x10] sm:$0xff]  ;;  %v30_v6 = vld [vmem:[#allocation2 + $0x18] sm:$0xff]  ;;  %s109_s1 = sshll.u32 %s168_s0, 4  ;;  %s110_s1 = int_to_ptr.vmem [resolvable:$true] %s109_s1 }
   0xf   :  { %46 = vperm.xlu0 %121, %v43_v1   ;;  %v27_v3 = vld [vmem:[#allocation2] sm:$0xff]  ;;  %v32_v8 = vld [vmem:[#allocation2 + $0x28] sm:$0xff]  ;;  %v33_v9 = vld [vmem:[#allocation2 + $0x30] sm:$0xff]  ;;  %s142_s2 = scalar_lea.vmem %s110_s1, 2048  ;;  %p147_p6 = scmp.lt.s32.totalorder %s110_s1, %s110_s1 }
  0x10   :  { %v31_v7 = vld [vmem:[#allocation2 + $0x20] sm:$0xff]  ;;  %v34_v10 = vld [vmem:[#allocation2 + $0x38] sm:$0xff]  ;;  %v36_v12 = vld [vmem:[#allocation2 + $0x48] sm:$0xff]  ;;  %p143_p5 = scmp.ne.s32.totalorder %s110_s1, %s142_s2  ;;  %p148_p7 = scmp.lt.s32.totalorder %s142_s2, %s142_s2 }
  0x11   :  { %v35_v11 = vld [vmem:[#allocation2 + $0x40] sm:$0xff]  ;;  %v37_v14 = vld [vmem:[#allocation2 + $0x50] sm:$0xff]  ;;  %v38_v15 = vld [vmem:[#allocation2 + $0x58] sm:$0xff] }
  0x12   :  { %v39_v16 = vld [vmem:[#allocation2 + $0x60] sm:$0xff]  ;;  %v40_v17 = vld [vmem:[#allocation2 + $0x68] sm:$0xff]  ;;  %v41_v18 = vld [vmem:[#allocation2 + $0x70] sm:$0xff]  ;;  %p149_p8 = por %p148_p7, %p147_p6 }
  0x13   :  { %68 = vperm.xlu0 %121, %v65_v2   ;;  %v42_v19 = vld [vmem:[#allocation2 + $0x78] sm:$0xff] }
  0x14   :  { %p150_p9 = pnand %p149_p8, %p143_p5 }
  0x8a   :  { %v47_v13 = vpop.permute.xlu0 %46 }
  0x8b   :  { %v49_v20 = vmul.f32 %v47_v13, %v27_v3  ;;  %v50_v21 = vmul.f32 %v47_v13, %v28_v4  ;;  %v51_v22 = vmul.f32 %v47_v13, %v29_v5  ;;  %v52_v23 = vmul.f32 %v47_v13, %v30_v6 }
  0x8c   :  { %v53_v24 = vmul.f32 %v47_v13, %v31_v7  ;;  %v54_v25 = vmul.f32 %v47_v13, %v32_v8  ;;  %v55_v26 = vmul.f32 %v47_v13, %v33_v9  ;;  %v56_v27 = vmul.f32 %v47_v13, %v34_v10 }
  0x8d   :  { %v57_v28 = vmul.f32 %v47_v13, %v35_v11  ;;  %v58_v29 = vmul.f32 %v47_v13, %v36_v12  ;;  %v59_v30 = vmul.f32 %v47_v13, %v37_v14  ;;  %v60_v31 = vmul.f32 %v47_v13, %v38_v15 }
  0x8e   :  { %v69_v32 = vpop.permute.xlu0 %68  ;;  %v61_v33 = vmul.f32 %v47_v13, %v39_v16  ;;  %v62_v34 = vmul.f32 %v47_v13, %v40_v17  ;;  %v63_v35 = vmul.f32 %v47_v13, %v41_v18  ;;  %v64_v36 = vmul.f32 %v47_v13, %v42_v19 }
  0x8f   :  { %v71_v37 = vadd.f32 %v69_v32, %v49_v20  ;;  %v72_v38 = vadd.f32 %v69_v32, %v50_v21  ;;  %v73_v39 = vadd.f32 %v69_v32, %v51_v22  ;;  %v74_v40 = vadd.f32 %v69_v32, %v52_v23 }
  0x90   :  { %v75_v41 = vadd.f32 %v69_v32, %v53_v24  ;;  %v76_v42 = vadd.f32 %v69_v32, %v54_v25  ;;  %v77_v43 = vadd.f32 %v69_v32, %v55_v26  ;;  %v78_v44 = vadd.f32 %v69_v32, %v56_v27 }
  0x91   :  { %v79_v45 = vadd.f32 %v69_v32, %v57_v28  ;;  %v80_v46 = vadd.f32 %v69_v32, %v58_v29  ;;  %v81_v47 = vadd.f32 %v69_v32, %v59_v30  ;;  %v82_v48 = vadd.f32 %v69_v32, %v60_v31  ;;  %87 = vst [vmem:[#allocation5] sm:$0xff] %v71_v37 }
  0x92   :  { %88 = vst [vmem:[#allocation5 + $0x8] sm:$0xff] %v72_v38  ;;  %89 = vst [vmem:[#allocation5 + $0x10] sm:$0xff] %v73_v39  ;;  %v83_v49 = vadd.f32 %v69_v32, %v61_v33  ;;  %v84_v50 = vadd.f32 %v69_v32, %v62_v34  ;;  %v85_v51 = vadd.f32 %v69_v32, %v63_v35 }
  0x93   :  { %90 = vst [vmem:[#allocation5 + $0x18] sm:$0xff] %v74_v40  ;;  %v86_v52 = vadd.f32 %v69_v32, %v64_v36  ;;  %91 = vst [vmem:[#allocation5 + $0x20] sm:$0xff] %v75_v41 }
  0x94   :  { %92 = vst [vmem:[#allocation5 + $0x28] sm:$0xff] %v76_v42  ;;  %93 = vst [vmem:[#allocation5 + $0x30] sm:$0xff] %v77_v43 }
  0x95   :  { %94 = vst [vmem:[#allocation5 + $0x38] sm:$0xff] %v78_v44  ;;  %95 = vst [vmem:[#allocation5 + $0x40] sm:$0xff] %v79_v45 }
  0x96   :  { %96 = vst [vmem:[#allocation5 + $0x48] sm:$0xff] %v80_v46  ;;  %97 = vst [vmem:[#allocation5 + $0x50] sm:$0xff] %v81_v47 }
  0x97   :  { %98 = vst [vmem:[#allocation5 + $0x58] sm:$0xff] %v82_v48  ;;  %99 = vst [vmem:[#allocation5 + $0x60] sm:$0xff] %v83_v49 }
  0x98   :  { %100 = vst [vmem:[#allocation5 + $0x68] sm:$0xff] %v84_v50  ;;  %101 = vst [vmem:[#allocation5 + $0x70] sm:$0xff] %v85_v51 }
  0x99   :  { %102 = vst [vmem:[#allocation5 + $0x78] sm:$0xff] %v86_v52 }
  0x9a   :  { %153 = shalt.err (!%p150_p9)
}
  0x9b   :  { %112 = dma.vmem_to_hbm [thread:$0]  %s110_s1, 2048, %s204_s3, [#allocation4]  }
  0x9c   :  { %164 = dma.done.wait [#allocation4], 2048  }
  0x9d   :  { %165 = vsyncadd [#allocation4], 4294965248 }
  0x9e   :  { %116 = vsyncpa [#allocation3], 1 }
  0x9f   :  { %117 = vsyncpa [#allocation4], 1 }

</bundles_post_ra>
